<compile_context>
chip_gen: v5e
topology: v5e:2x2
jax: 0.10.0
libtpu: 0.0.40
codegen_flags: <defaults>
</compile_context>

<pallas_src>
import functools

import numpy as np
import jax
import jax.numpy as jnp
from jax import lax
from jax.experimental import pallas as pl
from jax.experimental.pallas import tpu as pltpu


def _round_up(x, m):
    return (x + m - 1) // m * m


# ---------------------------------------------------------------------------
# Host-side table construction (static-shape numpy; nothing traced)
# ---------------------------------------------------------------------------
def _interp_tables(l_in, l_out):
    """i0, i1, frac for torch F.interpolate(mode='linear', align_corners=True)."""
    if l_out > 1:
        src = (np.arange(l_out, dtype=np.float32) * np.float32(l_in - 1)) / np.float32(l_out - 1)
    else:
        src = np.zeros((l_out,), dtype=np.float32)
    i0 = np.clip(np.floor(src).astype(np.int64), 0, l_in - 1)
    i1 = np.clip(i0 + 1, 0, l_in - 1)
    frac = (src - i0.astype(np.float32)).astype(np.float32)
    return i0, i1, frac


def _build_tap_tables(l_in, l_in_p, l_out, tile_l, n_lt, k_size, pad_left):
    """128-aligned per-tile band starts + per-tap interp tables.

    Returns:
      starts : (n_lt,) int32, multiples of 128 (start of the input band).
      tabs   : (n_lt, 4*K, tile_l) f32, rows per tap k ('same' padding and tile
               tail padding already zeroed into the weight rows):
                 [4k+0] i0-start  [4k+1] i1-start  [4k+2] (1-frac)*valid  [4k+3] frac*valid
      band_in: lane width of the input band (multiple of 128, <= l_in_p).
    """
    i0, i1, frac = _interp_tables(l_in, l_out)
    t = np.arange(tile_l)

    # pass 1: exact band extent per tile over all taps / valid positions
    lo = np.zeros((n_lt,), np.int64)
    hi = np.zeros((n_lt,), np.int64)
    for lt in range(n_lt):
        t_lo, t_hi, seen = l_in - 1, 0, False
        for k in range(k_size):
            j_up = lt * tile_l + t + k - pad_left
            valid = (j_up >= 0) & (j_up < l_out)
            if not valid.any():
                continue
            jc = np.clip(j_up, 0, max(l_out - 1, 0))
            t_lo = min(t_lo, int(i0[jc][valid].min()))
            t_hi = max(t_hi, int(i1[jc][valid].max()))
            seen = True
        lo[lt], hi[lt] = (t_lo, t_hi) if seen else (0, 0)

    q_start = (lo // 128) * 128                       # 128-aligned band starts
    band_req = int((hi - q_start).max()) + 1
    band_in = min(l_in_p, _round_up(band_req, 128))   # lane dim: multiple of 128
    starts = np.clip(q_start, 0, l_in_p - band_in)    # stays 128-aligned & in bounds

    # pass 2: per-tap relative index / weight rows
    tabs = np.zeros((n_lt, 4 * k_size, tile_l), np.float32)
    for lt in range(n_lt):
        s = int(starts[lt])
        for k in range(k_size):
            j_up = lt * tile_l + t + k - pad_left
            valid = (j_up >= 0) & (j_up < l_out)
            jc = np.clip(j_up, 0, max(l_out - 1, 0))
            tabs[lt, 4 * k + 0] = np.where(valid, i0[jc] - s, 0).astype(np.float32)
            tabs[lt, 4 * k + 1] = np.where(valid, i1[jc] - s, 0).astype(np.float32)
            tabs[lt, 4 * k + 2] = np.where(valid, 1.0 - frac[jc], 0.0).astype(np.float32)
            tabs[lt, 4 * k + 3] = np.where(valid, frac[jc], 0.0).astype(np.float32)

    assert tabs[:, 0::4].min() >= 0 and tabs[:, 1::4].max() < band_in
    return starts.astype(np.int32), tabs, band_in


# ---------------------------------------------------------------------------
# Kernel
# ---------------------------------------------------------------------------
def _resize_conv1d_kernel(starts_ref, x_ref, tab_ref, w_ref, b_ref, o_ref, *,
                          band_in, k_size, tile_l, b_blk, c_dtype):
    # starts_ref: (n_lt,) int32 SMEM (scalar prefetch)
    # x_ref:   (b_blk, Cin_pad, Lin_p)    compute dtype
    # tab_ref: (4*K, tile_l)              f32 per-tap tables for this tile
    # w_ref:   (K, Cout, Cin_pad)         compute dtype
    # b_ref:   (Cout, 1)                  f32
    # o_ref:   (b_blk, Cout, tile_l)      out dtype
    lt = pl.program_id(0)
    start = pl.multiple_of(starts_ref[lt], 128)
    c_out = o_ref.shape[1]

    # 128-aligned input band for every batch in this block (loaded once).
    x_bands = [x_ref[bi, :, pl.ds(start, band_in)] for bi in range(b_blk)]
    accs = [jnp.zeros((c_out, tile_l), jnp.float32) for _ in range(b_blk)]

    # Band row index, reused by every tap's generated interp matrix.
    row = lax.broadcasted_iota(jnp.int32, (band_in, tile_l), 0)

    for k in range(k_size):
        r = 4 * k
        i0k = tab_ref[pl.ds(r + 0, 1), :].astype(jnp.int32)   # (1, tile_l)
        i1k = tab_ref[pl.ds(r + 1, 1), :].astype(jnp.int32)
        w0k = tab_ref[pl.ds(r + 2, 1), :]                     # f32
        w1k = tab_ref[pl.ds(r + 3, 1), :]
        # Banded interp matrix for tap k, generated on the VPU (never streamed).
        pk = (jnp.where(row == i0k, w0k, 0.0)
              + jnp.where(row == i1k, w1k, 0.0)).astype(c_dtype)
        wk = w_ref[k]                                          # (Cout, Cin_pad)
        for bi in range(b_blk):
            yk = jnp.dot(x_bands[bi], pk,
                         preferred_element_type=jnp.float32)   # (Cin_pad, tile_l)
            accs[bi] = accs[bi] + jnp.dot(wk, yk.astype(wk.dtype),
                                          preferred_element_type=jnp.float32)

    bias = b_ref[...]                                          # (Cout, 1) f32
    for bi in range(b_blk):
        o_ref[bi] = (accs[bi] + bias).astype(o_ref.dtype)


# ---------------------------------------------------------------------------
# Wrapper
# ---------------------------------------------------------------------------
def resize_conv1d(x, weight, bias, stride, *, compute_dtype=None,
                  max_tile=512, batch_block=8):
    """x: (B, Cin, Lin); weight: (Cout, Cin, K); bias: (Cout,)."""
    b, c_in, l_in = x.shape
    c_out, c_in_w, k_size = weight.shape
    assert c_in_w == c_in
    out_dtype = x.dtype
    c_dtype = jnp.dtype(compute_dtype if compute_dtype is not None else x.dtype)

    l_out = stride * l_in
    pad_left = (k_size - 1) // 2                 # matches torch Conv1d padding='same'

    # ---- output tiling: lane-dense tiles (multiples of 128) -----------------
    l_out_p = _round_up(l_out, 128)
    if l_out_p <= max_tile:
        tile_l, n_lt = l_out_p, 1
    else:
        tile_l = max_tile
        n_lt = pl.cdiv(l_out_p, tile_l)
        l_out_p = n_lt * tile_l

    # ---- input padding: 128-aligned band slices always stay in bounds -------
    l_in_p = _round_up(l_in, 128)
    c_in_p = _round_up(c_in, 8)

    starts_np, tabs_np, band_in = _build_tap_tables(
        l_in, l_in_p, l_out, tile_l, n_lt, k_size, pad_left)

    # ---- batch blocking: fold several batches into one grid step ------------
    b_blk = 1
    for d in range(min(b, batch_block), 0, -1):
        if b % d == 0:
            b_blk = d
            break
    n_bb = b // b_blk

    starts = jnp.asarray(starts_np)                                  # (n_lt,) int32
    tabs = jnp.asarray(tabs_np)                                      # f32, tiny
    w_k = jnp.pad(jnp.transpose(weight, (2, 0, 1)),                  # (K, Cout, Cin_pad)
                  ((0, 0), (0, 0), (0, c_in_p - c_in))).astype(c_dtype)
    bias2d = bias.reshape(c_out, 1).astype(jnp.float32)
    x_p = jnp.pad(x, ((0, 0), (0, c_in_p - c_in),
                      (0, l_in_p - l_in))).astype(c_dtype)

    kernel = functools.partial(
        _resize_conv1d_kernel, band_in=band_in, k_size=k_size,
        tile_l=tile_l, b_blk=b_blk, c_dtype=c_dtype)

    # VMEM budget: small pipeline blocks + f32 temps; cap below v7x's 64 MiB.
    elt_c = jnp.dtype(c_dtype).itemsize
    elt_o = jnp.dtype(out_dtype).itemsize
    vmem_est = (2 * b_blk * c_in_p * l_in_p * elt_c              # x block (dbl buf)
                + 2 * 4 * k_size * tile_l * 4                    # tap tables (dbl buf)
                + 2 * b_blk * c_out * tile_l * elt_o             # out block (dbl buf)
                + k_size * c_out * c_in_p * elt_c + c_out * 4    # weights + bias
                + 4 * (3 * band_in * tile_l                      # iota/mask/P_k temps
                       + (b_blk + 1) * (c_in_p + c_out) * tile_l))
    vmem_limit = int(min(48 * 2 ** 20, max(8 * 2 ** 20, 4 * vmem_est)))

    out = pl.pallas_call(
        kernel,
        out_shape=jax.ShapeDtypeStruct((b, c_out, l_out_p), out_dtype),
        grid_spec=pltpu.PrefetchScalarGridSpec(
            num_scalar_prefetch=1,
            grid=(n_lt, n_bb),                  # length tiles outer, batch inner
            in_specs=[
                pl.BlockSpec((b_blk, c_in_p, l_in_p), lambda lt, bb, st: (bb, 0, 0)),
                pl.BlockSpec((None, 4 * k_size, tile_l), lambda lt, bb, st: (lt, 0, 0)),
                pl.BlockSpec((k_size, c_out, c_in_p), lambda lt, bb, st: (0, 0, 0)),
                pl.BlockSpec((c_out, 1), lambda lt, bb, st: (0, 0)),
            ],
            out_specs=pl.BlockSpec((b_blk, c_out, tile_l),
                                   lambda lt, bb, st: (bb, 0, lt)),
        ),
        compiler_params=pltpu.CompilerParams(
            dimension_semantics=("parallel", "parallel"),
            vmem_limit_bytes=vmem_limit),
    )(starts, x_p, tabs, w_k, bias2d)

    return out[:, :, :l_out] if l_out_p != l_out else out


# ---------------------------------------------------------------------------
# Pure-JAX reference (independent path) for validation
# ---------------------------------------------------------------------------
def _reference(x, weight, bias, stride):
    b, c_in, l_in = x.shape
    c_out, _, k_size = weight.shape
    l_out = stride * l_in
    if l_out > 1:
        src = jnp.arange(l_out, dtype=jnp.float32) * (l_in - 1) / (l_out - 1)
    else:
        src = jnp.zeros((l_out,), dtype=jnp.float32)
    i0 = jnp.clip(jnp.floor(src).astype(jnp.int32), 0, l_in - 1)
    i1 = jnp.clip(i0 + 1, 0, l_in - 1)
    frac = src - i0.astype(jnp.float32)
    x_up = x[:, :, i0] * (1.0 - frac) + x[:, :, i1] * frac          # (B, Cin, Lout)
    total_pad = k_size - 1
    pad_left = total_pad // 2
    pad_right = total_pad - pad_left
    out = jax.lax.conv_general_dilated(
        x_up, weight, window_strides=(1,), padding=[(pad_left, pad_right)],
        dimension_numbers=("NCH", "OIH", "NCH"),
        precision=jax.lax.Precision.HIGHEST)
    return out + bias[None, :, None]


if __name__ == "__main__":
    key = jax.random.PRNGKey(0)

    def make_case(key, b, c_in, c_out, l_in, k_size):
        kx, kw, kb = jax.random.split(key, 3)
        x = jax.random.normal(kx, (b, c_in, l_in), dtype=jnp.float32)
        w = 0.01 * jax.random.normal(kw, (c_out, c_in, k_size), dtype=jnp.float32)
        bb = 0.1 * jax.random.normal(kb, (c_out,), dtype=jnp.float32)
        return x, w, bb

    k1, k2, k3, k4 = jax.random.split(key, 4)

    # 1) small shapes consistent with the module (odd K, single length tile)
    x1, w1, b1 = make_case(k1, 2, 4, 6, 16, 3)
    out1 = jax.block_until_ready(resize_conv1d(x1, w1, b1, 2))
    ref1 = _reference(x1, w1, b1, 2)
    assert out1.shape == (2, 6, 32)
    assert jnp.allclose(out1, ref1, atol=5e-4, rtol=5e-3)

    # 2) even kernel size (asymmetric 'same' padding)
    x2, w2, b2 = make_case(k2, 2, 4, 6, 16, 4)
    out2 = jax.block_until_ready(resize_conv1d(x2, w2, b2, 2))
    ref2 = _reference(x2, w2, b2, 2)
    assert jnp.allclose(out2, ref2, atol=5e-4, rtol=5e-3)

    # 3) longer signal -> multi-tile output, 128-aligned banded input slices
    x3, w3, b3 = make_case(k3, 1, 8, 8, 512, 5)
    out3 = jax.block_until_ready(resize_conv1d(x3, w3, b3, 2))
    ref3 = _reference(x3, w3, b3, 2)
    assert out3.shape == (1, 8, 1024)
    assert jnp.allclose(out3, ref3, atol=5e-4, rtol=5e-3)

    # 4) batch-blocked step (B=4 folded into one grid step), stride 3, padded tail
    x4, w4, b4 = make_case(k4, 4, 4, 6, 64, 5)
    out4 = jax.block_until_ready(resize_conv1d(x4, w4, b4, 3))
    ref4 = _reference(x4, w4, b4, 3)
    assert out4.shape == (4, 6, 192)
    assert jnp.allclose(out4, ref4, atol=5e-4, rtol=5e-3)

    # 5) bf16 MXU-operand path (f32 accumulation), loose tolerance
    out5 = jax.block_until_ready(
        resize_conv1d(x1, w1, b1, 2, compute_dtype=jnp.bfloat16))
    assert out5.dtype == jnp.float32
    assert jnp.allclose(out5, ref1, atol=5e-3, rtol=5e-2)

    # 6) batch axis of the grid exercised explicitly (batch_block=1 -> n_bb=2)
    out6 = jax.block_until_ready(resize_conv1d(x1, w1, b1, 2, batch_block=1))
    assert jnp.allclose(out6, ref1, atol=5e-4, rtol=5e-3)

    print("KERNEL_OK")
</pallas_src>

<mosaic_0001>
module attributes {stable_mosaic.version = 11 : i64} {
  func.func @_resize_conv1d_kernel(%arg0: i32, %arg1: i32, %arg2: memref<1xi32, #tpu.memory_space<smem>>, %arg3: memref<2x8x128xf32, #tpu.memory_space<vmem>>, %arg4: memref<1x12x128xf32, #tpu.memory_space<vmem>>, %arg5: memref<3x6x8xf32, #tpu.memory_space<vmem>>, %arg6: memref<6x1xf32, #tpu.memory_space<vmem>>, %arg7: memref<2x6x128xf32, #tpu.memory_space<vmem>>) attributes {dimension_semantics = [#tpu.dimension_semantics<parallel>, #tpu.dimension_semantics<parallel>], iteration_bounds = array<i64: 1, 1>, scalar_prefetch = 1 : i64, scratch_operands = 0 : i64, tpu.core_type = #tpu.core_type<tc>, window_params = [{transform_indices = @transform_0, window_bounds = array<i64: 2, 8, 128>}, {transform_indices = @transform_1, window_bounds = array<i64: 1, 12, 128>}, {pipeline_mode = #tpu.pipeline_mode<synchronous>, transform_indices = @transform_2, window_bounds = array<i64: 3, 6, 8>}, {pipeline_mode = #tpu.pipeline_mode<synchronous>, transform_indices = @transform_3, window_bounds = array<i64: 6, 1>}, {transform_indices = @transform_4, window_bounds = array<i64: 2, 6, 128>}]} {
    %0 = arith.index_cast %arg0 : i32 to index
    %1 = memref.load %arg2[%0] : memref<1xi32, #tpu.memory_space<smem>>
    %2 = tpu.assume_multiple %1, 128 : i32
    %c0 = arith.constant 0 : index
    %c0_0 = arith.constant 0 : index
    %3 = arith.index_cast %2 : i32 to index
    %4 = vector.load %arg3[%c0, %c0_0, %3] : memref<2x8x128xf32, #tpu.memory_space<vmem>>, vector<1x8x128xf32>
    %5 = vector.shape_cast %4 : vector<1x8x128xf32> to vector<8x128xf32>
    %c1 = arith.constant 1 : index
    %c0_1 = arith.constant 0 : index
    %6 = arith.index_cast %2 : i32 to index
    %7 = vector.load %arg3[%c1, %c0_1, %6] : memref<2x8x128xf32, #tpu.memory_space<vmem>>, vector<1x8x128xf32>
    %8 = vector.shape_cast %7 : vector<1x8x128xf32> to vector<8x128xf32>
    %cst = arith.constant 0.000000e+00 : f32
    %9 = vector.broadcast %cst : f32 to vector<6x128xf32>
    %cst_2 = arith.constant 0.000000e+00 : f32
    %10 = vector.broadcast %cst_2 : f32 to vector<6x128xf32>
    %11 = tpu.iota {dimensions = array<i32: 0>} : vector<128x128xi32>
    %c0_3 = arith.constant 0 : index
    %c0_4 = arith.constant 0 : index
    %c0_5 = arith.constant 0 : index
    %12 = vector.load %arg4[%c0_3, %c0_4, %c0_5] : memref<1x12x128xf32, #tpu.memory_space<vmem>>, vector<1x1x128xf32>
    %13 = vector.shape_cast %12 : vector<1x1x128xf32> to vector<1x128xf32>
    %14 = arith.fptosi %13 : vector<1x128xf32> to vector<1x128xi32>
    %c0_6 = arith.constant 0 : index
    %c1_7 = arith.constant 1 : index
    %c0_8 = arith.constant 0 : index
    %15 = vector.load %arg4[%c0_6, %c1_7, %c0_8] : memref<1x12x128xf32, #tpu.memory_space<vmem>>, vector<1x1x128xf32>
    %16 = vector.shape_cast %15 : vector<1x1x128xf32> to vector<1x128xf32>
    %17 = arith.fptosi %16 : vector<1x128xf32> to vector<1x128xi32>
    %c0_9 = arith.constant 0 : index
    %c2 = arith.constant 2 : index
    %c0_10 = arith.constant 0 : index
    %18 = vector.load %arg4[%c0_9, %c2, %c0_10] : memref<1x12x128xf32, #tpu.memory_space<vmem>>, vector<1x1x128xf32>
    %19 = vector.shape_cast %18 : vector<1x1x128xf32> to vector<1x128xf32>
    %c0_11 = arith.constant 0 : index
    %c3 = arith.constant 3 : index
    %c0_12 = arith.constant 0 : index
    %20 = vector.load %arg4[%c0_11, %c3, %c0_12] : memref<1x12x128xf32, #tpu.memory_space<vmem>>, vector<1x1x128xf32>
    %21 = vector.shape_cast %20 : vector<1x1x128xf32> to vector<1x128xf32>
    %22 = vector.broadcast %14 : vector<1x128xi32> to vector<128x128xi32>
    %23 = arith.cmpi eq, %11, %22 : vector<128x128xi32>
    %cst_13 = arith.constant 0.000000e+00 : f32
    %24 = vector.shape_cast %19 : vector<1x128xf32> to vector<1x128xf32>
    %25 = vector.broadcast %24 : vector<1x128xf32> to vector<128x128xf32>
    %26 = vector.broadcast %cst_13 : f32 to vector<128x128xf32>
    %27 = arith.select %23, %25, %26 : vector<128x128xi1>, vector<128x128xf32>
    %28 = vector.broadcast %17 : vector<1x128xi32> to vector<128x128xi32>
    %29 = arith.cmpi eq, %11, %28 : vector<128x128xi32>
    %cst_14 = arith.constant 0.000000e+00 : f32
    %30 = vector.shape_cast %21 : vector<1x128xf32> to vector<1x128xf32>
    %31 = vector.broadcast %30 : vector<1x128xf32> to vector<128x128xf32>
    %32 = vector.broadcast %cst_14 : f32 to vector<128x128xf32>
    %33 = arith.select %29, %31, %32 : vector<128x128xi1>, vector<128x128xf32>
    %34 = arith.addf %27, %33 : vector<128x128xf32>
    %c0_15 = arith.constant 0 : index
    %c0_16 = arith.constant 0 : index
    %c0_17 = arith.constant 0 : index
    %35 = vector.load %arg5[%c0_15, %c0_16, %c0_17] : memref<3x6x8xf32, #tpu.memory_space<vmem>>, vector<1x6x8xf32>
    %36 = vector.shape_cast %35 : vector<1x6x8xf32> to vector<6x8xf32>
    %cst_18 = arith.constant dense<0.000000e+00> : vector<8x128xf32>
    %37 = tpu.matmul %5, %34, %cst_18 {dimension_numbers = #tpu.dot_dimension_numbers<[1], [0], [0], [1], [0, 0, 1, 1], [], []>} : vector<8x128xf32>, vector<128x128xf32>, vector<8x128xf32> -> vector<8x128xf32>
    %cst_19 = arith.constant dense<0.000000e+00> : vector<6x128xf32>
    %38 = tpu.matmul %36, %37, %cst_19 {dimension_numbers = #tpu.dot_dimension_numbers<[1], [0], [0], [1], [0, 0, 1, 1], [], []>} : vector<6x8xf32>, vector<8x128xf32>, vector<6x128xf32> -> vector<6x128xf32>
    %39 = arith.addf %9, %38 : vector<6x128xf32>
    %cst_20 = arith.constant dense<0.000000e+00> : vector<8x128xf32>
    %40 = tpu.matmul %8, %34, %cst_20 {dimension_numbers = #tpu.dot_dimension_numbers<[1], [0], [0], [1], [0, 0, 1, 1], [], []>} : vector<8x128xf32>, vector<128x128xf32>, vector<8x128xf32> -> vector<8x128xf32>
    %cst_21 = arith.constant dense<0.000000e+00> : vector<6x128xf32>
    %41 = tpu.matmul %36, %40, %cst_21 {dimension_numbers = #tpu.dot_dimension_numbers<[1], [0], [0], [1], [0, 0, 1, 1], [], []>} : vector<6x8xf32>, vector<8x128xf32>, vector<6x128xf32> -> vector<6x128xf32>
    %42 = arith.addf %10, %41 : vector<6x128xf32>
    %c0_22 = arith.constant 0 : index
    %c4 = arith.constant 4 : index
    %c0_23 = arith.constant 0 : index
    %43 = vector.load %arg4[%c0_22, %c4, %c0_23] : memref<1x12x128xf32, #tpu.memory_space<vmem>>, vector<1x1x128xf32>
    %44 = vector.shape_cast %43 : vector<1x1x128xf32> to vector<1x128xf32>
    %45 = arith.fptosi %44 : vector<1x128xf32> to vector<1x128xi32>
    %c0_24 = arith.constant 0 : index
    %c5 = arith.constant 5 : index
    %c0_25 = arith.constant 0 : index
    %46 = vector.load %arg4[%c0_24, %c5, %c0_25] : memref<1x12x128xf32, #tpu.memory_space<vmem>>, vector<1x1x128xf32>
    %47 = vector.shape_cast %46 : vector<1x1x128xf32> to vector<1x128xf32>
    %48 = arith.fptosi %47 : vector<1x128xf32> to vector<1x128xi32>
    %c0_26 = arith.constant 0 : index
    %c6 = arith.constant 6 : index
    %c0_27 = arith.constant 0 : index
    %49 = vector.load %arg4[%c0_26, %c6, %c0_27] : memref<1x12x128xf32, #tpu.memory_space<vmem>>, vector<1x1x128xf32>
    %50 = vector.shape_cast %49 : vector<1x1x128xf32> to vector<1x128xf32>
    %c0_28 = arith.constant 0 : index
    %c7 = arith.constant 7 : index
    %c0_29 = arith.constant 0 : index
    %51 = vector.load %arg4[%c0_28, %c7, %c0_29] : memref<1x12x128xf32, #tpu.memory_space<vmem>>, vector<1x1x128xf32>
    %52 = vector.shape_cast %51 : vector<1x1x128xf32> to vector<1x128xf32>
    %53 = vector.broadcast %45 : vector<1x128xi32> to vector<128x128xi32>
    %54 = arith.cmpi eq, %11, %53 : vector<128x128xi32>
    %cst_30 = arith.constant 0.000000e+00 : f32
    %55 = vector.shape_cast %50 : vector<1x128xf32> to vector<1x128xf32>
    %56 = vector.broadcast %55 : vector<1x128xf32> to vector<128x128xf32>
    %57 = vector.broadcast %cst_30 : f32 to vector<128x128xf32>
    %58 = arith.select %54, %56, %57 : vector<128x128xi1>, vector<128x128xf32>
    %59 = vector.broadcast %48 : vector<1x128xi32> to vector<128x128xi32>
    %60 = arith.cmpi eq, %11, %59 : vector<128x128xi32>
    %cst_31 = arith.constant 0.000000e+00 : f32
    %61 = vector.shape_cast %52 : vector<1x128xf32> to vector<1x128xf32>
    %62 = vector.broadcast %61 : vector<1x128xf32> to vector<128x128xf32>
    %63 = vector.broadcast %cst_31 : f32 to vector<128x128xf32>
    %64 = arith.select %60, %62, %63 : vector<128x128xi1>, vector<128x128xf32>
    %65 = arith.addf %58, %64 : vector<128x128xf32>
    %c1_32 = arith.constant 1 : index
    %c0_33 = arith.constant 0 : index
    %c0_34 = arith.constant 0 : index
    %66 = vector.load %arg5[%c1_32, %c0_33, %c0_34] : memref<3x6x8xf32, #tpu.memory_space<vmem>>, vector<1x6x8xf32>
    %67 = vector.shape_cast %66 : vector<1x6x8xf32> to vector<6x8xf32>
    %cst_35 = arith.constant dense<0.000000e+00> : vector<8x128xf32>
    %68 = tpu.matmul %5, %65, %cst_35 {dimension_numbers = #tpu.dot_dimension_numbers<[1], [0], [0], [1], [0, 0, 1, 1], [], []>} : vector<8x128xf32>, vector<128x128xf32>, vector<8x128xf32> -> vector<8x128xf32>
    %cst_36 = arith.constant dense<0.000000e+00> : vector<6x128xf32>
    %69 = tpu.matmul %67, %68, %cst_36 {dimension_numbers = #tpu.dot_dimension_numbers<[1], [0], [0], [1], [0, 0, 1, 1], [], []>} : vector<6x8xf32>, vector<8x128xf32>, vector<6x128xf32> -> vector<6x128xf32>
    %70 = arith.addf %39, %69 : vector<6x128xf32>
    %cst_37 = arith.constant dense<0.000000e+00> : vector<8x128xf32>
    %71 = tpu.matmul %8, %65, %cst_37 {dimension_numbers = #tpu.dot_dimension_numbers<[1], [0], [0], [1], [0, 0, 1, 1], [], []>} : vector<8x128xf32>, vector<128x128xf32>, vector<8x128xf32> -> vector<8x128xf32>
    %cst_38 = arith.constant dense<0.000000e+00> : vector<6x128xf32>
    %72 = tpu.matmul %67, %71, %cst_38 {dimension_numbers = #tpu.dot_dimension_numbers<[1], [0], [0], [1], [0, 0, 1, 1], [], []>} : vector<6x8xf32>, vector<8x128xf32>, vector<6x128xf32> -> vector<6x128xf32>
    %73 = arith.addf %42, %72 : vector<6x128xf32>
    %c0_39 = arith.constant 0 : index
    %c8 = arith.constant 8 : index
    %c0_40 = arith.constant 0 : index
    %74 = vector.load %arg4[%c0_39, %c8, %c0_40] : memref<1x12x128xf32, #tpu.memory_space<vmem>>, vector<1x1x128xf32>
    %75 = vector.shape_cast %74 : vector<1x1x128xf32> to vector<1x128xf32>
    %76 = arith.fptosi %75 : vector<1x128xf32> to vector<1x128xi32>
    %c0_41 = arith.constant 0 : index
    %c9 = arith.constant 9 : index
    %c0_42 = arith.constant 0 : index
    %77 = vector.load %arg4[%c0_41, %c9, %c0_42] : memref<1x12x128xf32, #tpu.memory_space<vmem>>, vector<1x1x128xf32>
    %78 = vector.shape_cast %77 : vector<1x1x128xf32> to vector<1x128xf32>
    %79 = arith.fptosi %78 : vector<1x128xf32> to vector<1x128xi32>
    %c0_43 = arith.constant 0 : index
    %c10 = arith.constant 10 : index
    %c0_44 = arith.constant 0 : index
    %80 = vector.load %arg4[%c0_43, %c10, %c0_44] : memref<1x12x128xf32, #tpu.memory_space<vmem>>, vector<1x1x128xf32>
    %81 = vector.shape_cast %80 : vector<1x1x128xf32> to vector<1x128xf32>
    %c0_45 = arith.constant 0 : index
    %c11 = arith.constant 11 : index
    %c0_46 = arith.constant 0 : index
    %82 = vector.load %arg4[%c0_45, %c11, %c0_46] : memref<1x12x128xf32, #tpu.memory_space<vmem>>, vector<1x1x128xf32>
    %83 = vector.shape_cast %82 : vector<1x1x128xf32> to vector<1x128xf32>
    %84 = vector.broadcast %76 : vector<1x128xi32> to vector<128x128xi32>
    %85 = arith.cmpi eq, %11, %84 : vector<128x128xi32>
    %cst_47 = arith.constant 0.000000e+00 : f32
    %86 = vector.shape_cast %81 : vector<1x128xf32> to vector<1x128xf32>
    %87 = vector.broadcast %86 : vector<1x128xf32> to vector<128x128xf32>
    %88 = vector.broadcast %cst_47 : f32 to vector<128x128xf32>
    %89 = arith.select %85, %87, %88 : vector<128x128xi1>, vector<128x128xf32>
    %90 = vector.broadcast %79 : vector<1x128xi32> to vector<128x128xi32>
    %91 = arith.cmpi eq, %11, %90 : vector<128x128xi32>
    %cst_48 = arith.constant 0.000000e+00 : f32
    %92 = vector.shape_cast %83 : vector<1x128xf32> to vector<1x128xf32>
    %93 = vector.broadcast %92 : vector<1x128xf32> to vector<128x128xf32>
    %94 = vector.broadcast %cst_48 : f32 to vector<128x128xf32>
    %95 = arith.select %91, %93, %94 : vector<128x128xi1>, vector<128x128xf32>
    %96 = arith.addf %89, %95 : vector<128x128xf32>
    %c2_49 = arith.constant 2 : index
    %c0_50 = arith.constant 0 : index
    %c0_51 = arith.constant 0 : index
    %97 = vector.load %arg5[%c2_49, %c0_50, %c0_51] : memref<3x6x8xf32, #tpu.memory_space<vmem>>, vector<1x6x8xf32>
    %98 = vector.shape_cast %97 : vector<1x6x8xf32> to vector<6x8xf32>
    %cst_52 = arith.constant dense<0.000000e+00> : vector<8x128xf32>
    %99 = tpu.matmul %5, %96, %cst_52 {dimension_numbers = #tpu.dot_dimension_numbers<[1], [0], [0], [1], [0, 0, 1, 1], [], []>} : vector<8x128xf32>, vector<128x128xf32>, vector<8x128xf32> -> vector<8x128xf32>
    %cst_53 = arith.constant dense<0.000000e+00> : vector<6x128xf32>
    %100 = tpu.matmul %98, %99, %cst_53 {dimension_numbers = #tpu.dot_dimension_numbers<[1], [0], [0], [1], [0, 0, 1, 1], [], []>} : vector<6x8xf32>, vector<8x128xf32>, vector<6x128xf32> -> vector<6x128xf32>
    %101 = arith.addf %70, %100 : vector<6x128xf32>
    %cst_54 = arith.constant dense<0.000000e+00> : vector<8x128xf32>
    %102 = tpu.matmul %8, %96, %cst_54 {dimension_numbers = #tpu.dot_dimension_numbers<[1], [0], [0], [1], [0, 0, 1, 1], [], []>} : vector<8x128xf32>, vector<128x128xf32>, vector<8x128xf32> -> vector<8x128xf32>
    %cst_55 = arith.constant dense<0.000000e+00> : vector<6x128xf32>
    %103 = tpu.matmul %98, %102, %cst_55 {dimension_numbers = #tpu.dot_dimension_numbers<[1], [0], [0], [1], [0, 0, 1, 1], [], []>} : vector<6x8xf32>, vector<8x128xf32>, vector<6x128xf32> -> vector<6x128xf32>
    %104 = arith.addf %73, %103 : vector<6x128xf32>
    %c0_56 = arith.constant 0 : index
    %c0_57 = arith.constant 0 : index
    %105 = vector.load %arg6[%c0_56, %c0_57] : memref<6x1xf32, #tpu.memory_space<vmem>>, vector<6x1xf32>
    %106 = vector.broadcast %105 : vector<6x1xf32> to vector<6x128xf32>
    %107 = arith.addf %101, %106 : vector<6x128xf32>
    %c0_58 = arith.constant 0 : index
    %c0_59 = arith.constant 0 : index
    %c0_60 = arith.constant 0 : index
    %108 = vector.load %arg7[%c0_58, %c0_59, %c0_60] : memref<2x6x128xf32, #tpu.memory_space<vmem>>, vector<1x6x128xf32>
    %109 = vector.shape_cast %108 : vector<1x6x128xf32> to vector<6x128xf32>
    %110 = vector.shape_cast %107 : vector<6x128xf32> to vector<1x6x128xf32>
    tpu.vector_store %arg7[%c0_58, %c0_59, %c0_60], %110 {strides = array<i32>} : memref<2x6x128xf32, #tpu.memory_space<vmem>>, vector<1x6x128xf32>,
    %111 = vector.broadcast %105 : vector<6x1xf32> to vector<6x128xf32>
    %112 = arith.addf %104, %111 : vector<6x128xf32>
    %c1_61 = arith.constant 1 : index
    %c0_62 = arith.constant 0 : index
    %c0_63 = arith.constant 0 : index
    %113 = vector.load %arg7[%c1_61, %c0_62, %c0_63] : memref<2x6x128xf32, #tpu.memory_space<vmem>>, vector<1x6x128xf32>
    %114 = vector.shape_cast %113 : vector<1x6x128xf32> to vector<6x128xf32>
    %115 = vector.shape_cast %112 : vector<6x128xf32> to vector<1x6x128xf32>
    tpu.vector_store %arg7[%c1_61, %c0_62, %c0_63], %115 {strides = array<i32>} : memref<2x6x128xf32, #tpu.memory_space<vmem>>, vector<1x6x128xf32>,
    return
  }
  func.func @transform_0(%arg0: i32, %arg1: i32, %arg2: memref<1xi32, #tpu.memory_space<smem>>) -> (i32, i32, i32) {
    %c0_i32 = arith.constant 0 : i32
    %c0_i32_0 = arith.constant 0 : i32
    %c0_i32_1 = arith.constant 0 : i32
    return %arg1, %c0_i32, %c0_i32_0 : i32, i32, i32
  }
  func.func @transform_1(%arg0: i32, %arg1: i32, %arg2: memref<1xi32, #tpu.memory_space<smem>>) -> (i32, i32, i32) {
    %c0_i32 = arith.constant 0 : i32
    %c0_i32_0 = arith.constant 0 : i32
    %c0_i32_1 = arith.constant 0 : i32
    return %arg0, %c0_i32, %c0_i32_0 : i32, i32, i32
  }
  func.func @transform_2(%arg0: i32, %arg1: i32, %arg2: memref<1xi32, #tpu.memory_space<smem>>) -> (i32, i32, i32) {
    %c0_i32 = arith.constant 0 : i32
    %c0_i32_0 = arith.constant 0 : i32
    %c0_i32_1 = arith.constant 0 : i32
    %c0_i32_2 = arith.constant 0 : i32
    return %c0_i32, %c0_i32_0, %c0_i32_1 : i32, i32, i32
  }
  func.func @transform_3(%arg0: i32, %arg1: i32, %arg2: memref<1xi32, #tpu.memory_space<smem>>) -> (i32, i32) {
    %c0_i32 = arith.constant 0 : i32
    %c0_i32_0 = arith.constant 0 : i32
    %c0_i32_1 = arith.constant 0 : i32
    return %c0_i32, %c0_i32_0 : i32, i32
  }
  func.func @transform_4(%arg0: i32, %arg1: i32, %arg2: memref<1xi32, #tpu.memory_space<smem>>) -> (i32, i32, i32) {
    %c0_i32 = arith.constant 0 : i32
    %c0_i32_0 = arith.constant 0 : i32
    return %arg1, %c0_i32, %arg0 : i32, i32, i32
  }
}

</mosaic_0001>

<bundles_post_ra>
// kernel: tpu_custom_call.1
= control target key start
LH: loop header
LB: loop body
LE: loop exit
PB: predicated region body
PF: predicated region fallthrough
CT: control target
= control target key end

     0   :  { %11 = vsyncpa [#allocation5], 0  ;;  %s683_s21 = smov [#allocation4]   ;;  %s684_s23 = smov 128   ;;  %s1219_s0 = inlined_call_operand.<no memory space> [shape: s32[1], index: 0, kind: input, shape index: {}]   ;;  %s1220_s1 = inlined_call_operand.hbm [shape: f32[2,8,128], index: 1, kind: input, shape index: {}]   ;;  %s1221_s2 = inlined_call_operand.vmem [shape: f32[1,12,128], index: 2, kind: input, shape index: {}]   ;;  %s1222_s3 = inlined_call_operand.vmem [shape: f32[3,6,8], index: 3, kind: input, shape index: {}]   ;;  %s1223_s4 = inlined_call_operand.vmem [shape: f32[6,1], index: 4, kind: input, shape index: {}]   ;;  %s1224_s5 = inlined_call_operand.vmem [shape: f32[2,6,128], index: 5, kind: output, shape index: {}]  }
   0x1   :  { %s16_s20 = sshll.u32 %s1220_s1, 4  ;;  %s18_s22 = sshll.u32 %s683_s21, 4  ;;  %s17_s20 = int_to_ptr.hbm [resolvable:$true] %s16_s20  ;;  %s19_s22 = int_to_ptr.vmem [resolvable:$true] %s18_s22 }
   0x2   :  { %s685_s24 = smov 8  }
   0x3   :  { %24 = dma.hbm_to_vmem [thread:$0]  %s17_s20, 256, %s19_s22, [#allocation5], %s684_s23, %s684_s23, %s685_s24  }
   0x4   :  { %681 = dma.done.wait [#allocation5], 256  }
   0x5   :  { %682 = vsyncadd [#allocation5], 4294967040  ;;  %v43_v0 = vlaneseq  ;;  %v191_v11 = vld [vmem:[%s1221_s2 + $0x4] sm:$0x1]  ;;  %v193_v12 = vld [vmem:[%s1221_s2 + $0x5] sm:$0x1] }
   0x6   :  { %vm626_vm0 = vcmp.lt.s32.totalorder %v191_v11, 0  ;;  %v627_v13 = vceil.f32 %v191_v11  ;;  %v628_v14 = vfloor.f32 %v191_v11  ;;  %vm631_vm1 = vcmp.lt.s32.totalorder %v193_v12, 0  ;;  %v60_v17 = vld [vmem:[%s1221_s2] sm:$0x1]  ;;  %v62_v18 = vld [vmem:[%s1221_s2 + $0x1] sm:$0x1] }
   0x7   :  { %v720_v1 = vshrl.u32 %v43_v0, 7  ;;  %v632_v15 = vceil.f32 %v193_v12  ;;  %v633_v16 = vfloor.f32 %v193_v12  ;;  %vm616_vm2 = vcmp.lt.s32.totalorder %v60_v17, 0  ;;  %v770_v28 = vld [vmem:[%s1221_s2 + $0x6] ss:$0 sm:$0xff]  ;;  %v777_v32 = vld [vmem:[%s1221_s2 + $0x7] ss:$0 sm:$0xff] }
   0x8   :  { %v629_v21 = vsel %vm626_vm0, %v627_v13, %v628_v14  ;;  %v617_v22 = vceil.f32 %v60_v17  ;;  %v618_v23 = vfloor.f32 %v60_v17  ;;  %vm621_vm3 = vcmp.lt.s32.totalorder %v62_v18, 0  ;;  %v821_v49 = vld [vmem:[%s1221_s2 + $0x2] ss:$0 sm:$0xff]  ;;  %v834_v54 = vld [vmem:[%s1221_s2 + $0x3] ss:$0 sm:$0xff]  ;;  %s36_s17 = sshra.s32 %s1219_s0, 7 }
   0x9   :  { %v723_v2 = vadd.s32 120, %v720_v1  ;;  %v726_v3 = vadd.s32 112, %v720_v1  ;;  %v729_v4 = vadd.s32 104, %v720_v1  ;;  %v732_v5 = vadd.s32 96, %v720_v1  ;;  %s1030_s0 = scalar_lea.vmem [#allocation4], %s36_s17 }
   0xa   :  { %v735_v6 = vadd.s32 88, %v720_v1  ;;  %v738_v7 = vadd.s32 80, %v720_v1  ;;  %v741_v8 = vadd.s32 72, %v720_v1  ;;  %v744_v9 = vadd.s32 64, %v720_v1 }
   0xb   :  { %v747_v10 = vadd.s32 56, %v720_v1  ;;  %v762_v19 = vadd.s32 48, %v720_v1  ;;  %v765_v20 = vadd.s32 40, %v720_v1  ;;  %v630_v24 = vcvt.f32.s32 %v629_v21 }
   0xc   :  { %v634_v25 = vsel %vm631_vm1, %v632_v15, %v633_v16  ;;  %v622_v26 = vceil.f32 %v62_v18  ;;  %v619_v29 = vsel %vm616_vm2, %v617_v22, %v618_v23  ;;  %v623_v30 = vfloor.f32 %v62_v18 }
   0xd   :  { %v635_v27 = vcvt.f32.s32 %v634_v25  ;;  %v772_v31 = vperm.slane %v630_v24, 0  ;;  %v620_v33 = vcvt.f32.s32 %v619_v29  ;;  %v780_v34 = vadd.s32 32, %v720_v1 }
   0xe   :  { %v783_v35 = vadd.s32 24, %v720_v1  ;;  %v624_v37 = vsel %vm621_vm3, %v622_v26, %v623_v30  ;;  %v788_v38 = vadd.s32 16, %v720_v1  ;;  %v791_v39 = vadd.s32 8, %v720_v1 }
   0xf   :  { %v785_v36 = vperm.slane %v635_v27, 0  ;;  %vm213_vm4 = vcmp.eq.s32.totalorder %v723_v2, %v772_v31  ;;  %vm212_vm5 = vcmp.eq.s32.totalorder %v726_v3, %v772_v31  ;;  %vm211_vm6 = vcmp.eq.s32.totalorder %v729_v4, %v772_v31 }
  0x10   :  { %vm210_vm7 = vcmp.eq.s32.totalorder %v732_v5, %v772_v31  ;;  %v230_v40 = vsel %vm213_vm4, %v770_v28, 0.0  ;;  %v229_v41 = vsel %vm212_vm5, %v770_v28, 0.0  ;;  %v228_v44 = vsel %vm211_vm6, %v770_v28, 0.0 }
  0x11   :  { %vm247_vm8 = vcmp.eq.s32.totalorder %v723_v2, %v785_v36  ;;  %vm246_vm9 = vcmp.eq.s32.totalorder %v726_v3, %v785_v36  ;;  %vm245_vm10 = vcmp.eq.s32.totalorder %v729_v4, %v785_v36  ;;  %v227_v48 = vsel %vm210_vm7, %v770_v28, 0.0 }
  0x12   :  { %v264_v42 = vsel %vm247_vm8, %v777_v32, 0.0  ;;  %v263_v43 = vsel %vm246_vm9, %v777_v32, 0.0  ;;  %v262_v47 = vsel %vm245_vm10, %v777_v32, 0.0  ;;  %vm244_vm11 = vcmp.eq.s32.totalorder %v732_v5, %v785_v36 }
  0x13   :  { %v812_v45 = vadd.f32 %v264_v42, %v230_v40  ;;  %v814_v46 = vadd.f32 %v263_v43, %v229_v41  ;;  %v823_v50 = vadd.f32 %v262_v47, %v228_v44  ;;  %v625_v51 = vcvt.f32.s32 %v624_v37 }
  0x14   :  { %v827_v52 = vperm.slane %v620_v33, 0  ;;  %v261_v53 = vsel %vm244_vm11, %v777_v32, 0.0  ;;  %vm209_vm12 = vcmp.eq.s32.totalorder %v735_v6, %v772_v31  ;;  %vm243_vm13 = vcmp.eq.s32.totalorder %v735_v6, %v785_v36 }
  0x15   :  { %283 = vmatpush.msra.mxu2 %v812_v45  ;;  %vm208_vm14 = vcmp.eq.s32.totalorder %v738_v7, %v772_v31  ;;  %v842_v55 = vadd.f32 %v261_v53, %v227_v48  ;;  %v846_v56 = vperm.slane %v625_v51, 0  ;;  %v226_v57 = vsel %vm209_vm12, %v770_v28, 0.0 }
  0x16   :  { %vm82_vm15 = vcmp.eq.s32.totalorder %v723_v2, %v827_v52  ;;  %v260_v59 = vsel %vm243_vm13, %v777_v32, 0.0  ;;  %vm81_vm0 = vcmp.eq.s32.totalorder %v726_v3, %v827_v52  ;;  %v225_v60 = vsel %vm208_vm14, %v770_v28, 0.0 }
  0x17   :  { %284 = vmatpush.msra.mxu2 %v814_v46  ;;  %v99_v58 = vsel %vm82_vm15, %v821_v49, 0.0  ;;  %vm116_vm1 = vcmp.eq.s32.totalorder %v723_v2, %v846_v56  ;;  %v857_v61 = vadd.f32 %v260_v59, %v226_v57  ;;  %v98_v62 = vsel %vm81_vm0, %v821_v49, 0.0 }
  0x18   :  { %vm115_vm2 = vcmp.eq.s32.totalorder %v726_v3, %v846_v56  ;;  %v133_v63 = vsel %vm116_vm1, %v834_v54, 0.0  ;;  %vm242_vm3 = vcmp.eq.s32.totalorder %v738_v7, %v785_v36  ;;  %vm80_vm4 = vcmp.eq.s32.totalorder %v729_v4, %v827_v52 }
  0x19   :  { %285 = vmatpush.msra.mxu2 %v823_v50  ;;  %v132_v0 = vsel %vm115_vm2, %v834_v54, 0.0  ;;  %v149_v11 = vadd.f32 %v133_v63, %v99_v58  ;;  %v259_v13 = vsel %vm242_vm3, %v777_v32, 0.0  ;;  %v97_v14 = vsel %vm80_vm4, %v821_v49, 0.0 }
  0x1a   :  { %v148_v12 = vadd.f32 %v132_v0, %v98_v62  ;;  %v872_v15 = vadd.f32 %v259_v13, %v225_v60  ;;  %vm114_vm5 = vcmp.eq.s32.totalorder %v729_v4, %v846_v56  ;;  %vm207_vm6 = vcmp.eq.s32.totalorder %v741_v8, %v772_v31 }
  0x1b   :  { %286 = vmatpush.msra.mxu2 %v842_v55  ;;  %vm241_vm7 = vcmp.eq.s32.totalorder %v741_v8, %v785_v36  ;;  %151 = vmatpush.msra.mxu0 %v149_v11  ;;  %v131_v16 = vsel %vm114_vm5, %v834_v54, 0.0  ;;  %v224_v17 = vsel %vm207_vm6, %v770_v28, 0.0  ;;  %vm79_vm8 = vcmp.eq.s32.totalorder %v732_v5, %v827_v52 }
  0x1c   :  { %v258_v18 = vsel %vm241_vm7, %v777_v32, 0.0  ;;  %171 = vmatpush.msra.mxu1 %v149_v11  ;;  %v147_v21 = vadd.f32 %v131_v16, %v97_v14  ;;  %v96_v23 = vsel %vm79_vm8, %v821_v49, 0.0  ;;  %vm113_vm9 = vcmp.eq.s32.totalorder %v732_v5, %v846_v56 }
  0x1d   :  { %287 = vmatpush.msra.mxu2 %v857_v61  ;;  %v886_v22 = vadd.f32 %v258_v18, %v224_v17  ;;  %152 = vmatpush.msra.mxu0 %v148_v12  ;;  %v130_v24 = vsel %vm113_vm9, %v834_v54, 0.0  ;;  %vm206_vm10 = vcmp.eq.s32.totalorder %v744_v9, %v772_v31  ;;  %vm240_vm11 = vcmp.eq.s32.totalorder %v744_v9, %v785_v36 }
  0x1e   :  { %vm78_vm12 = vcmp.eq.s32.totalorder %v735_v6, %v827_v52  ;;  %172 = vmatpush.msra.mxu1 %v148_v12  ;;  %v146_v25 = vadd.f32 %v130_v24, %v96_v23  ;;  %v223_v26 = vsel %vm206_vm10, %v770_v28, 0.0  ;;  %v257_v27 = vsel %vm240_vm11, %v777_v32, 0.0 }
  0x1f   :  { %288 = vmatpush.msra.mxu2 %v872_v15  ;;  %v95_v29 = vsel %vm78_vm12, %v821_v49, 0.0  ;;  %153 = vmatpush.msra.mxu0 %v147_v21  ;;  %v902_v30 = vadd.f32 %v257_v27, %v223_v26  ;;  %vm112_vm13 = vcmp.eq.s32.totalorder %v735_v6, %v846_v56  ;;  %vm205_vm14 = vcmp.eq.s32.totalorder %v747_v10, %v772_v31 }
  0x20   :  { %vm239_vm15 = vcmp.eq.s32.totalorder %v747_v10, %v785_v36  ;;  %v129_v33 = vsel %vm112_vm13, %v834_v54, 0.0  ;;  %v222_v37 = vsel %vm205_vm14, %v770_v28, 0.0  ;;  %vm77_vm0 = vcmp.eq.s32.totalorder %v738_v7, %v827_v52  ;;  %173 = vmatpush.msra.mxu1 %v147_v21 }
  0x21   :  { %289 = vmatpush.msra.mxu2 %v886_v22  ;;  %v256_v40 = vsel %vm239_vm15, %v777_v32, 0.0  ;;  %154 = vmatpush.msra.mxu0 %v146_v25  ;;  %v145_v41 = vadd.f32 %v129_v33, %v95_v29  ;;  %v94_v43 = vsel %vm77_vm0, %v821_v49, 0.0  ;;  %vm111_vm1 = vcmp.eq.s32.totalorder %v738_v7, %v846_v56 }
  0x22   :  { %v916_v42 = vadd.f32 %v256_v40, %v222_v37  ;;  %v128_v44 = vsel %vm111_vm1, %v834_v54, 0.0  ;;  %vm204_vm2 = vcmp.eq.s32.totalorder %v762_v19, %v772_v31  ;;  %vm238_vm3 = vcmp.eq.s32.totalorder %v762_v19, %v785_v36  ;;  %174 = vmatpush.msra.mxu1 %v146_v25 }
  0x23   :  { %290 = vmatpush.msra.mxu2 %v902_v30  ;;  %vm76_vm4 = vcmp.eq.s32.totalorder %v741_v8, %v827_v52  ;;  %155 = vmatpush.msra.mxu0 %v145_v41  ;;  %v144_v47 = vadd.f32 %v128_v44, %v94_v43  ;;  %v221_v48 = vsel %vm204_vm2, %v770_v28, 0.0  ;;  %v255_v51 = vsel %vm238_vm3, %v777_v32, 0.0 }
  0x24   :  { %v93_v53 = vsel %vm76_vm4, %v821_v49, 0.0  ;;  %v933_v57 = vadd.f32 %v255_v51, %v221_v48  ;;  %vm110_vm5 = vcmp.eq.s32.totalorder %v741_v8, %v846_v56  ;;  %vm203_vm6 = vcmp.eq.s32.totalorder %v765_v20, %v772_v31  ;;  %175 = vmatpush.msra.mxu1 %v145_v41 }
  0x25   :  { %291 = vmatpush.msra.mxu2 %v916_v42  ;;  %vm237_vm7 = vcmp.eq.s32.totalorder %v765_v20, %v785_v36  ;;  %156 = vmatpush.msra.mxu0 %v144_v47  ;;  %v127_v58 = vsel %vm110_vm5, %v834_v54, 0.0  ;;  %v220_v59 = vsel %vm203_vm6, %v770_v28, 0.0  ;;  %vm75_vm8 = vcmp.eq.s32.totalorder %v744_v9, %v827_v52 }
  0x26   :  { %v254_v60 = vsel %vm237_vm7, %v777_v32, 0.0  ;;  %v143_v62 = vadd.f32 %v127_v58, %v93_v53  ;;  %v92_v0 = vsel %vm75_vm8, %v821_v49, 0.0  ;;  %vm109_vm9 = vcmp.eq.s32.totalorder %v744_v9, %v846_v56  ;;  %176 = vmatpush.msra.mxu1 %v144_v47 }
  0x27   :  { %292 = vmatpush.msra.mxu2 %v933_v57  ;;  %v947_v63 = vadd.f32 %v254_v60, %v220_v59  ;;  %v126_v11 = vsel %vm109_vm9, %v834_v54, 0.0  ;;  %vm202_vm10 = vcmp.eq.s32.totalorder %v780_v34, %v772_v31  ;;  %vm236_vm11 = vcmp.eq.s32.totalorder %v780_v34, %v785_v36 }
  0x28   :  { %vm74_vm12 = vcmp.eq.s32.totalorder %v747_v10, %v827_v52  ;;  %157 = vmatpush.msra.mxu0 %v143_v62  ;;  %v142_v12 = vadd.f32 %v126_v11, %v92_v0  ;;  %v219_v13 = vsel %vm202_vm10, %v770_v28, 0.0  ;;  %v253_v14 = vsel %vm236_vm11, %v777_v32, 0.0  ;;  %177 = vmatpush.msra.mxu1 %v143_v62 }
  0x29   :  { %293 = vmatpush.msra.mxu2 %v947_v63  ;;  %v91_v16 = vsel %vm74_vm12, %v821_v49, 0.0  ;;  %v963_v17 = vadd.f32 %v253_v14, %v219_v13  ;;  %vm108_vm13 = vcmp.eq.s32.totalorder %v747_v10, %v846_v56  ;;  %vm201_vm14 = vcmp.eq.s32.totalorder %v783_v35, %v772_v31 }
  0x2a   :  { %vm235_vm15 = vcmp.eq.s32.totalorder %v783_v35, %v785_v36  ;;  %158 = vmatpush.msra.mxu0 %v142_v12  ;;  %v125_v18 = vsel %vm108_vm13, %v834_v54, 0.0  ;;  %v218_v21 = vsel %vm201_vm14, %v770_v28, 0.0  ;;  %vm73_vm0 = vcmp.eq.s32.totalorder %v762_v19, %v827_v52  ;;  %178 = vmatpush.msra.mxu1 %v142_v12 }
  0x2b   :  { %v252_v23 = vsel %vm235_vm15, %v777_v32, 0.0  ;;  %294 = vmatpush.msra.mxu2 %v963_v17  ;;  %v141_v24 = vadd.f32 %v125_v18, %v91_v16  ;;  %v90_v26 = vsel %vm73_vm0, %v821_v49, 0.0  ;;  %vm107_vm1 = vcmp.eq.s32.totalorder %v762_v19, %v846_v56 }
  0x2c   :  { %v977_v25 = vadd.f32 %v252_v23, %v218_v21  ;;  %v124_v27 = vsel %vm107_vm1, %v834_v54, 0.0  ;;  %vm200_vm2 = vcmp.eq.s32.totalorder %v788_v38, %v772_v31  ;;  %vm234_vm3 = vcmp.eq.s32.totalorder %v788_v38, %v785_v36 }
  0x2d   :  { %vm72_vm4 = vcmp.eq.s32.totalorder %v765_v20, %v827_v52  ;;  %159 = vmatpush.msra.mxu0 %v141_v24  ;;  %v140_v29 = vadd.f32 %v124_v27, %v90_v26  ;;  %v217_v33 = vsel %vm200_vm2, %v770_v28, 0.0  ;;  %v251_v37 = vsel %vm234_vm3, %v777_v32, 0.0  ;;  %179 = vmatpush.msra.mxu1 %v141_v24 }
  0x2e   :  { %295 = vmatpush.msra.mxu2 %v977_v25  ;;  %v89_v40 = vsel %vm72_vm4, %v821_v49, 0.0  ;;  %v996_v41 = vadd.f32 %v251_v37, %v217_v33  ;;  %vm106_vm5 = vcmp.eq.s32.totalorder %v765_v20, %v846_v56  ;;  %vm199_vm6 = vcmp.eq.s32.totalorder %v791_v39, %v772_v31 }
  0x2f   :  { %vm233_vm7 = vcmp.eq.s32.totalorder %v791_v39, %v785_v36  ;;  %160 = vmatpush.msra.mxu0 %v140_v29  ;;  %v123_v43 = vsel %vm106_vm5, %v834_v54, 0.0  ;;  %v216_v44 = vsel %vm199_vm6, %v770_v28, 0.0  ;;  %vm71_vm8 = vcmp.eq.s32.totalorder %v780_v34, %v827_v52  ;;  %180 = vmatpush.msra.mxu1 %v140_v29 }
  0x30   :  { %v250_v47 = vsel %vm233_vm7, %v777_v32, 0.0  ;;  %296 = vmatpush.msra.mxu2 %v996_v41  ;;  %v139_v48 = vadd.f32 %v123_v43, %v89_v40  ;;  %v88_v53 = vsel %vm71_vm8, %v821_v49, 0.0  ;;  %vm105_vm9 = vcmp.eq.s32.totalorder %v780_v34, %v846_v56 }
  0x31   :  { %v1010_v51 = vadd.f32 %v250_v47, %v216_v44  ;;  %v122_v58 = vsel %vm105_vm9, %v834_v54, 0.0  ;;  %vm198_vm10 = vcmp.eq.s32.totalorder %v720_v1, %v772_v31  ;;  %vm232_vm11 = vcmp.eq.s32.totalorder %v720_v1, %v785_v36  ;;  %v1033_v31 = vld [vmem:[%s1030_s0] sm:$0xff]  ;;  %v1068_v44 = vld [vmem:[%s1221_s2 + $0xa] ss:$0 sm:$0xff] }
  0x32   :  { %vm70_vm12 = vcmp.eq.s32.totalorder %v783_v35, %v827_v52  ;;  %161 = vmatpush.msra.mxu0 %v139_v48  ;;  %v138_v59 = vadd.f32 %v122_v58, %v88_v53  ;;  %v215_v60 = vsel %vm198_vm10, %v770_v28, 0.0  ;;  %v249_v62 = vsel %vm232_vm11, %v777_v32, 0.0  ;;  %181 = vmatpush.msra.mxu1 %v139_v48  ;;  %v1075_v48 = vld [vmem:[%s1221_s2 + $0xb] ss:$0 sm:$0xff] }
  0x33   :  { %297 = vmatpush.msra.mxu2 %v1010_v51  ;;  %v87_v0 = vsel %vm70_vm12, %v821_v49, 0.0  ;;  %v1026_v11 = vadd.f32 %v249_v62, %v215_v60  ;;  %vm104_vm13 = vcmp.eq.s32.totalorder %v783_v35, %v846_v56  ;;  %vm69_vm14 = vcmp.eq.s32.totalorder %v788_v38, %v827_v52 }
  0x34   :  { %vm103_vm15 = vcmp.eq.s32.totalorder %v788_v38, %v846_v56  ;;  %162 = vmatpush.msra.mxu0 %v138_v59  ;;  %v121_v28 = vsel %vm104_vm13, %v834_v54, 0.0  ;;  %v86_v32 = vsel %vm69_vm14, %v821_v49, 0.0  ;;  %vm68_vm0 = vcmp.eq.s32.totalorder %v791_v39, %v827_v52  ;;  %182 = vmatpush.msra.mxu1 %v138_v59 }
  0x35   :  { %v120_v36 = vsel %vm103_vm15, %v834_v54, 0.0  ;;  %298 = vmatpush.msra.mxu2 %v1026_v11  ;;  %v137_v12 = vadd.f32 %v121_v28, %v87_v0  ;;  %v85_v14 = vsel %vm68_vm0, %v821_v49, 0.0  ;;  %vm102_vm1 = vcmp.eq.s32.totalorder %v791_v39, %v846_v56 }
  0x36   :  { %v136_v13 = vadd.f32 %v120_v36, %v86_v32  ;;  %299 = vmatmul.f32.vlgmr.msra.gmra.mxu2 %v1033_v31  ;;  %v119_v16 = vsel %vm102_vm1, %v834_v54, 0.0  ;;  %vm67_vm2 = vcmp.eq.s32.totalorder %v720_v1, %v827_v52  ;;  %vm101_vm3 = vcmp.eq.s32.totalorder %v720_v1, %v846_v56  ;;  %v410_v52 = vld [vmem:[%s1221_s2 + $0x8] sm:$0x1] }
  0x37   :  { %163 = vmatpush.msra.mxu0 %v137_v12  ;;  %v135_v18 = vadd.f32 %v119_v16, %v85_v14  ;;  %v84_v21 = vsel %vm67_vm2, %v821_v49, 0.0  ;;  %v118_v23 = vsel %vm101_vm3, %v834_v54, 0.0  ;;  %183 = vmatpush.msra.mxu1 %v137_v12  ;;  %v637_v56 = vceil.f32 %v410_v52  ;;  %v412_v49 = vld [vmem:[%s1221_s2 + $0x9] sm:$0x1] }
  0x38   :  { %v134_v24 = vadd.f32 %v118_v23, %v84_v21  ;;  %v638_v26 = vfloor.f32 %v410_v52  ;;  %vm636_vm4 = vcmp.lt.s32.totalorder %v410_v52, 0  ;;  %vm641_vm5 = vcmp.lt.s32.totalorder %v412_v49, 0 }
  0x39   :  { %164 = vmatpush.msra.mxu0 %v136_v13  ;;  %184 = vmatpush.msra.mxu1 %v136_v13  ;;  %v642_v54 = vceil.f32 %v412_v49  ;;  %v643_v27 = vfloor.f32 %v412_v49 }
  0x3a   :  { %v639_v29 = vsel %vm636_vm4, %v637_v56, %v638_v26 }
  0x3b   :  { %165 = vmatpush.msra.mxu0 %v135_v18  ;;  %185 = vmatpush.msra.mxu1 %v135_v18  ;;  %v640_v33 = vcvt.f32.s32 %v639_v29  ;;  %v644_v37 = vsel %vm641_vm5, %v642_v54, %v643_v27  ;;  %v1144_v54 = vld [vmem:[%s1222_s3 + $0x8] sm:$0x3f] }
  0x3c   :  { %v645_v40 = vcvt.f32.s32 %v644_v37 }
  0x3d   :  { %166 = vmatpush.msra.mxu0 %v134_v24  ;;  %186 = vmatpush.msra.mxu1 %v134_v24  ;;  %v1063_v43 = vperm.slane %v640_v33, 0 }
  0x3e   :  { %167 = vmatmul.f32.vlgmr.msra.gmra.mxu0 %v1033_v31  ;;  %v1070_v47 = vperm.slane %v645_v40, 0 }
  0x3f   :  { %vm432_vm6 = vcmp.eq.s32.totalorder %v723_v2, %v1063_v43  ;;  %vm431_vm8 = vcmp.eq.s32.totalorder %v726_v3, %v1063_v43  ;;  %vm430_vm10 = vcmp.eq.s32.totalorder %v729_v4, %v1063_v43  ;;  %vm429_vm12 = vcmp.eq.s32.totalorder %v732_v5, %v1063_v43 }
  0x40   :  { %v449_v53 = vsel %vm432_vm6, %v1068_v44, 0.0  ;;  %vm466_vm7 = vcmp.eq.s32.totalorder %v723_v2, %v1070_v47  ;;  %vm465_vm9 = vcmp.eq.s32.totalorder %v726_v3, %v1070_v47  ;;  %v448_v60 = vsel %vm431_vm8, %v1068_v44, 0.0 }
  0x41   :  { %v483_v58 = vsel %vm466_vm7, %v1075_v48, 0.0  ;;  %v482_v62 = vsel %vm465_vm9, %v1075_v48, 0.0  ;;  %vm464_vm11 = vcmp.eq.s32.totalorder %v729_v4, %v1070_v47  ;;  %v447_v2 = vsel %vm430_vm10, %v1068_v44, 0.0 }
  0x42   :  { %v499_v59 = vadd.f32 %v483_v58, %v449_v53  ;;  %v498_v0 = vadd.f32 %v482_v62, %v448_v60  ;;  %v481_v28 = vsel %vm464_vm11, %v1075_v48, 0.0  ;;  %vm463_vm13 = vcmp.eq.s32.totalorder %v732_v5, %v1070_v47 }
  0x43   :  { %v497_v32 = vadd.f32 %v481_v28, %v447_v2  ;;  %v446_v3 = vsel %vm429_vm12, %v1068_v44, 0.0  ;;  %v480_v36 = vsel %vm463_vm13, %v1075_v48, 0.0  ;;  %vm428_vm14 = vcmp.eq.s32.totalorder %v735_v6, %v1063_v43 }
  0x44   :  { %546 = vmatpush.msrb.mxu1 %v499_v59  ;;  %502 = vmatpush.msrb.mxu2 %v499_v59  ;;  %v496_v4 = vadd.f32 %v480_v36, %v446_v3  ;;  %vm462_vm15 = vcmp.eq.s32.totalorder %v735_v6, %v1070_v47  ;;  %v445_v12 = vsel %vm428_vm14, %v1068_v44, 0.0  ;;  %vm427_vm0 = vcmp.eq.s32.totalorder %v738_v7, %v1063_v43 }
  0x45   :  { %v479_v13 = vsel %vm462_vm15, %v1075_v48, 0.0  ;;  %vm461_vm1 = vcmp.eq.s32.totalorder %v738_v7, %v1070_v47  ;;  %v444_v14 = vsel %vm427_vm0, %v1068_v44, 0.0  ;;  %vm426_vm2 = vcmp.eq.s32.totalorder %v741_v8, %v1063_v43 }
  0x46   :  { %547 = vmatpush.msrb.mxu1 %v498_v0  ;;  %503 = vmatpush.msrb.mxu2 %v498_v0  ;;  %v495_v5 = vadd.f32 %v479_v13, %v445_v12  ;;  %v478_v16 = vsel %vm461_vm1, %v1075_v48, 0.0  ;;  %vm460_vm3 = vcmp.eq.s32.totalorder %v741_v8, %v1070_v47  ;;  %v443_v18 = vsel %vm426_vm2, %v1068_v44, 0.0 }
  0x47   :  { %v494_v6 = vadd.f32 %v478_v16, %v444_v14  ;;  %v477_v21 = vsel %vm460_vm3, %v1075_v48, 0.0  ;;  %vm425_vm4 = vcmp.eq.s32.totalorder %v744_v9, %v1063_v43  ;;  %vm459_vm5 = vcmp.eq.s32.totalorder %v744_v9, %v1070_v47 }
  0x48   :  { %548 = vmatpush.msrb.mxu1 %v497_v32  ;;  %504 = vmatpush.msrb.mxu2 %v497_v32  ;;  %v493_v7 = vadd.f32 %v477_v21, %v443_v18  ;;  %v442_v23 = vsel %vm425_vm4, %v1068_v44, 0.0  ;;  %v476_v24 = vsel %vm459_vm5, %v1075_v48, 0.0  ;;  %vm424_vm6 = vcmp.eq.s32.totalorder %v747_v10, %v1063_v43 }
  0x49   :  { %v492_v8 = vadd.f32 %v476_v24, %v442_v23  ;;  %vm458_vm7 = vcmp.eq.s32.totalorder %v747_v10, %v1070_v47  ;;  %v441_v52 = vsel %vm424_vm6, %v1068_v44, 0.0  ;;  %vm423_vm8 = vcmp.eq.s32.totalorder %v762_v19, %v1063_v43 }
  0x4a   :  { %549 = vmatpush.msrb.mxu1 %v496_v4  ;;  %505 = vmatpush.msrb.mxu2 %v496_v4  ;;  %v475_v56 = vsel %vm458_vm7, %v1075_v48, 0.0  ;;  %vm457_vm9 = vcmp.eq.s32.totalorder %v762_v19, %v1070_v47  ;;  %v440_v26 = vsel %vm423_vm8, %v1068_v44, 0.0  ;;  %vm422_vm10 = vcmp.eq.s32.totalorder %v765_v20, %v1063_v43 }
  0x4b   :  { %v491_v9 = vadd.f32 %v475_v56, %v441_v52  ;;  %v474_v49 = vsel %vm457_vm9, %v1075_v48, 0.0  ;;  %vm456_vm11 = vcmp.eq.s32.totalorder %v765_v20, %v1070_v47  ;;  %vm303_vm12 = vcmask 64512  }
  0x4c   :  { %550 = vmatpush.msrb.mxu1 %v495_v5  ;;  %506 = vmatpush.msrb.mxu2 %v495_v5  ;;  %v490_v10 = vadd.f32 %v474_v49, %v440_v26  ;;  %v439_v19 = vsel %vm422_vm10, %v1068_v44, 0.0  ;;  %v473_v27 = vsel %vm456_vm11, %v1075_v48, 0.0  ;;  %vm421_vm13 = vcmp.eq.s32.totalorder %v780_v34, %v1063_v43 }
  0x4d   :  { %v489_v33 = vadd.f32 %v473_v27, %v439_v19  ;;  %vm455_vm14 = vcmp.eq.s32.totalorder %v780_v34, %v1070_v47  ;;  %v438_v20 = vsel %vm421_vm13, %v1068_v44, 0.0  ;;  %vm420_vm15 = vcmp.eq.s32.totalorder %v783_v35, %v1063_v43  ;;  %v606_v34 = vld [vmem:[%s1030_s0 + $0x8] sm:$0xff] }
  0x4e   :  { %551 = vmatpush.msrb.mxu1 %v494_v6  ;;  %507 = vmatpush.msrb.mxu2 %v494_v6  ;;  %v472_v37 = vsel %vm455_vm14, %v1075_v48, 0.0  ;;  %vm454_vm0 = vcmp.eq.s32.totalorder %v783_v35, %v1070_v47  ;;  %v437_v58 = vsel %vm420_vm15, %v1068_v44, 0.0  ;;  %vm419_vm1 = vcmp.eq.s32.totalorder %v788_v38, %v1063_v43 }
  0x4f   :  { %v488_v53 = vadd.f32 %v472_v37, %v438_v20  ;;  %v471_v59 = vsel %vm454_vm0, %v1075_v48, 0.0  ;;  %vm453_vm2 = vcmp.eq.s32.totalorder %v788_v38, %v1070_v47  ;;  %187 = vmatmul.f32.vlgmr.msra.gmra.mxu1 %v606_v34  ;;  %v436_v62 = vsel %vm419_vm1, %v1068_v44, 0.0 }
  0x50   :  { %552 = vmatpush.msrb.mxu1 %v493_v7  ;;  %508 = vmatpush.msrb.mxu2 %v493_v7  ;;  %v487_v60 = vadd.f32 %v471_v59, %v437_v58  ;;  %v470_v35 = vsel %vm453_vm2, %v1075_v48, 0.0  ;;  %vm418_vm3 = vcmp.eq.s32.totalorder %v791_v39, %v1063_v43  ;;  %vm452_vm4 = vcmp.eq.s32.totalorder %v791_v39, %v1070_v47  ;;  %v150_v39 = vld [vmem:[%s1222_s3] sm:$0x3f] }
  0x51   :  { %v486_v0 = vadd.f32 %v470_v35, %v436_v62  ;;  %v435_v2 = vsel %vm418_vm3, %v1068_v44, 0.0  ;;  %vm417_vm5 = vcmp.eq.s32.totalorder %v720_v1, %v1063_v43  ;;  %v469_v38 = vsel %vm452_vm4, %v1075_v48, 0.0 }
  0x52   :  { %553 = vmatpush.msrb.mxu1 %v492_v8  ;;  %509 = vmatpush.msrb.mxu2 %v492_v8  ;;  %vm451_vm6 = vcmp.eq.s32.totalorder %v720_v1, %v1070_v47  ;;  %v485_v28 = vadd.f32 %v469_v38, %v435_v2 }
  0x53   :  { %v468_v32 = vsel %vm451_vm6, %v1075_v48, 0.0 }
  0x54   :  { %554 = vmatpush.msrb.mxu1 %v491_v9  ;;  %510 = vmatpush.msrb.mxu2 %v491_v9 }
  0x56   :  { %555 = vmatpush.msrb.mxu1 %v490_v10  ;;  %511 = vmatpush.msrb.mxu2 %v490_v10 }
  0x58   :  { %556 = vmatpush.msrb.mxu1 %v489_v33  ;;  %512 = vmatpush.msrb.mxu2 %v489_v33 }
  0x5a   :  { %557 = vmatpush.msrb.mxu1 %v488_v53  ;;  %513 = vmatpush.msrb.mxu2 %v488_v53 }
  0x5c   :  { %558 = vmatpush.msrb.mxu1 %v487_v60  ;;  %514 = vmatpush.msrb.mxu2 %v487_v60 }
  0x5e   :  { %559 = vmatpush.msrb.mxu1 %v486_v0  ;;  %515 = vmatpush.msrb.mxu2 %v486_v0 }
  0x60   :  { %560 = vmatpush.msrb.mxu1 %v485_v28  ;;  %516 = vmatpush.msrb.mxu2 %v485_v28 }
  0xb9   :  { %v300_v29 = vpop.f32.mrf.mxu2 }
  0xba   :  { %322 = vmatpush.msra.mxu3 %v300_v29 }
  0xbb   :  { %v168_v40 = vpop.f32.mrf.mxu0  ;;  %608 = vmatmul.msk.f32.vlgmr.msra.gmra.mxu3 %vm303_vm12, %v1144_v54 }
  0xbc   :  { %345 = vmatpush.msrb.mxu3 %v168_v40 }
  0xbe   :  { %350 = vmatpush.msra.mxu3 %v812_v45  ;;  %v434_v45 = vsel %vm417_vm5, %v1068_v44, 0.0 }
  0xc0   :  { %351 = vmatpush.msra.mxu3 %v814_v46  ;;  %v484_v46 = vadd.f32 %v468_v32, %v434_v45 }
  0xc2   :  { %352 = vmatpush.msra.mxu3 %v823_v50  ;;  %561 = vmatpush.msrb.mxu1 %v484_v46 }
  0xc3   :  { %609 = vmatmul.msk.f32.vlgmr.msrb.gmra.mxu3 %vm303_vm12, %v150_v39  ;;  %562 = vmatmul.f32.vlgmr.msrb.gmra.mxu1 %v606_v34 }
  0xc4   :  { %353 = vmatpush.msra.mxu3 %v842_v55  ;;  %517 = vmatpush.msrb.mxu2 %v484_v46  ;;  %v612_v55 = vld [vmem:[%s1222_s3 + $0x10] sm:$0x3f] }
  0xc5   :  { %518 = vmatmul.f32.vlgmr.msrb.gmra.mxu2 %v1033_v31 }
  0xc6   :  { %354 = vmatpush.msra.mxu3 %v857_v61 }
  0xc8   :  { %355 = vmatpush.msra.mxu3 %v872_v15 }
  0xca   :  { %356 = vmatpush.msra.mxu3 %v886_v22 }
  0xcc   :  { %357 = vmatpush.msra.mxu3 %v902_v30  ;;  %v188_v1 = vpop.f32.mrf.mxu1  ;;  %v587_v30 = vld [vmem:[%s1223_s4] sm:$0x3f] }
  0xce   :  { %358 = vmatpush.msra.mxu3 %v916_v42  ;;  %v686_v42 = vmov 0  }
  0xcf   :  { %650 = vset.pattern.permute.xlu0 %v686_v42 }
  0xd0   :  { %359 = vmatpush.msra.mxu3 %v933_v57  ;;  %590 = vperm.xlu0 %650, %v587_v30  }
  0xd2   :  { %360 = vmatpush.msra.mxu3 %v947_v63 }
  0xd4   :  { %361 = vmatpush.msra.mxu3 %v963_v17 }
  0xd6   :  { %362 = vmatpush.msra.mxu3 %v977_v25 }
  0xd8   :  { %363 = vmatpush.msra.mxu3 %v996_v41 }
  0xda   :  { %364 = vmatpush.msra.mxu3 %v1010_v51 }
  0xdc   :  { %365 = vmatpush.msra.mxu3 %v1026_v11 }
  0xdd   :  { %366 = vmatmul.f32.vlgmr.msra.gmra.mxu3 %v606_v34 }
 0x13e   :  { %v324_v50 = vpop.f32.mrf.mxu3 }
 0x140   :  { %v563_v61 = vpop.f32.mrf.mxu1 }
 0x141   :  { %581 = vmatpush.msrb.mxu3 %v563_v61 }
 0x142   :  { %614 = vmatmul.msk.f32.vlgmr.msrb.gmra.mxu3 %vm303_vm12, %v612_v55  ;;  %v591_v11 = vpop.permute.xlu0 %590 }
 0x146   :  { %v347_v15 = vpop.f32.mrf.mxu3 }
 0x147   :  { %v348_v22 = vadd.f32 %v347_v15, %v324_v50 }
 0x148   :  { %v519_v63 = vpop.f32.mrf.mxu2 }
 0x160   :  { %v367_v57 = vpop.f32.mrf.mxu3 }
 0x161   :  { %385 = vmatpush.msrb.mxu0 %v367_v57 }
 0x162   :  { %610 = vmatmul.msk.f32.vlgmr.msrb.gmra.mxu0 %vm303_vm12, %v1144_v54 }
 0x163   :  { %405 = vmatpush.msra.mxu0 %v188_v1 }
 0x165   :  { %540 = vmatpush.msrb.mxu0 %v519_v63 }
 0x16a   :  { %611 = vmatmul.msk.f32.vlgmr.msra.gmra.mxu0 %vm303_vm12, %v150_v39 }
 0x172   :  { %613 = vmatmul.msk.f32.vlgmr.msrb.gmra.mxu0 %vm303_vm12, %v612_v55 }
 0x1c5   :  { %v583_v41 = vpop.f32.mrf.mxu3 }
 0x1df   :  { %v387_v17 = vpop.f32.mrf.mxu0 }
 0x1e7   :  { %v407_v25 = vpop.f32.mrf.mxu0 }
 0x1e8   :  { %v408_v51 = vadd.f32 %v407_v25, %v387_v17 }
 0x1ea   :  { %v586_v31 = vadd.f32 %v583_v41, %v408_v51 }
 0x1ec   :  { %v595_v43 = vadd.f32 %v591_v11, %v586_v31 }
 0x1ee   :  { %615 = vst [vmem:[%s1224_s5 + $0x8] sm:$0x3f] %v595_v43 }
 0x1ef   :  { %v542_v44 = vpop.f32.mrf.mxu0 }
 0x1f0   :  { %v545_v47 = vadd.f32 %v542_v44, %v348_v22 }
 0x1f2   :  { %v593_v48 = vadd.f32 %v591_v11, %v545_v47 }
 0x1f4   :  { %594 = vst [vmem:[%s1224_s5] sm:$0x3f] %v593_v48 }
 0x1f5   :  { %602 = vsyncpa [#allocation5], 1 }

</bundles_post_ra>
